<compile_context>
chip_gen: v5e
topology: v5e:2x2
jax: 0.10.0
libtpu: 0.0.40
codegen_flags: <defaults>
</compile_context>

<pallas_src>
import jax
import jax.numpy as jnp
from jax.experimental import pallas as pl
from jax.experimental.pallas import tpu as pltpu


def net_kernel(x_ref, w1_ref, b1_ref, w2_ref, o_ref, h_ref):
    """One grid step computes a (B, tn) slab of the softmax output.

    x_ref  : (B, D)  bf16  VMEM-resident (constant across grid)
    w1_ref : (D, H)  bf16  VMEM-resident (constant across grid)
    b1_ref : (1, H)  f32   VMEM-resident (constant across grid)
    w2_ref : (H, tn) bf16  column tile, streams per grid step
    o_ref  : (B, tn) f32   output tile
    h_ref  : (B, H)  bf16  scratch, persists across grid steps
    """
    # Layer 1: computed exactly once (grid axis is "arbitrary", so program 0
    # runs first on the core and the scratch persists for later tiles).
    @pl.when(pl.program_id(0) == 0)
    def _():
        h = jnp.dot(x_ref[...], w1_ref[...], preferred_element_type=jnp.float32)
        h = jnp.maximum(h + b1_ref[...], 0.0)   # b1 (1,H) broadcasts over batch
        h_ref[...] = h.astype(h_ref.dtype)

    # Layer 2 on the current output-column tile.  b2 is dropped: it adds the
    # same constant to every row of a column, which softmax(dim=0) cancels.
    logits = jnp.dot(h_ref[...], w2_ref[...], preferred_element_type=jnp.float32)

    # Column-wise softmax over the batch axis (dim=0).  Exact division so
    # columns sum to 1 to f32 precision.
    m = jnp.max(logits, axis=0, keepdims=True)
    e = jnp.exp(logits - m)
    s = jnp.sum(e, axis=0, keepdims=True)
    o_ref[...] = (e / s).astype(o_ref.dtype)


def _resident_spec(shape):
    """BlockSpec for a grid-invariant operand: single-buffered if supported."""
    index_map = lambda j: (0, 0)
    if hasattr(pl, "Buffered"):
        try:
            return pl.BlockSpec(shape, index_map, pipeline_mode=pl.Buffered(1))
        except TypeError:
            pass
    return pl.BlockSpec(shape, index_map)


def net_forward(x, w1, b1, w2, b2=None):
    # b2 accepted for API parity with the PyTorch module but unused (dead
    # under softmax over dim=0; see kernel comment).
    del b2
    B, D = x.shape
    H = w1.shape[1]
    O = w2.shape[1]

    # Output-column tiling: full width when small; otherwise lane-dense
    # multiples of 128 (256-wide slabs when the padded width allows).
    if O <= 128:
        tn, O_pad = O, O
    else:
        tn = 128
        O_pad = pl.cdiv(O, tn) * tn
        if O_pad % 256 == 0:
            tn = 256

    # bf16 MXU operands; bias stays f32.
    x_bf = x.astype(jnp.bfloat16)
    w1_bf = w1.astype(jnp.bfloat16)
    w2_bf = w2.astype(jnp.bfloat16)
    b1_f32 = jnp.asarray(b1, jnp.float32).reshape(1, H)
    if O_pad != O:
        w2_bf = jnp.pad(w2_bf, ((0, 0), (0, O_pad - O)))

    grid = (O_pad // tn,)

    # Explicit VMEM budget from the actual buffers (resident x/W1/b1 + h
    # scratch single-buffered, W2 tile + out tile double-buffered), with
    # headroom; clamped to a conservative cross-generation ceiling.
    vmem_bytes = (
        B * D * 2 + D * H * 2 + H * 4   # resident x, W1, b1
        + 2 * H * tn * 2                # W2 column tile (double-buffered)
        + 2 * B * tn * 4                # output tile (double-buffered)
        + B * H * 2                     # h scratch
    )
    vmem_limit = min(max(int(1.5 * vmem_bytes), 8 << 20), 100 << 20)

    out = pl.pallas_call(
        net_kernel,
        out_shape=jax.ShapeDtypeStruct((B, O_pad), jnp.float32),
        grid_spec=pltpu.PrefetchScalarGridSpec(
            num_scalar_prefetch=0,
            grid=grid,
            in_specs=[
                _resident_spec((B, D)),                    # x  : VMEM-resident
                _resident_spec((D, H)),                    # W1 : VMEM-resident
                _resident_spec((1, H)),                    # b1 : VMEM-resident
                pl.BlockSpec((H, tn), lambda j: (0, j)),   # W2 column tile
            ],
            out_specs=pl.BlockSpec((B, tn), lambda j: (0, j)),
            scratch_shapes=[pltpu.VMEM((B, H), jnp.bfloat16)],  # persistent h
        ),
        compiler_params=pltpu.CompilerParams(
            # "arbitrary" is required so the pl.when(program_id==0) layer-1
            # hoist is valid; a core-parallel split could skip program 0.
            dimension_semantics=("arbitrary",),
            vmem_limit_bytes=vmem_limit,
        ),
    )(x_bf, w1_bf, b1_f32, w2_bf)

    return out[:, :O] if O_pad != O else out


def init_params(key, input_dim, hidden_dim, output_dim):
    # Deterministic init mimicking nn.Linear's U(-1/sqrt(fan_in), 1/sqrt(fan_in)).
    k1, k2, k3, k4 = jax.random.split(key, 4)
    bound1 = 1.0 / jnp.sqrt(input_dim)
    bound2 = 1.0 / jnp.sqrt(hidden_dim)
    w1 = jax.random.uniform(k1, (input_dim, hidden_dim), jnp.float32, -bound1, bound1)
    b1 = jax.random.uniform(k2, (hidden_dim,), jnp.float32, -bound1, bound1)
    w2 = jax.random.uniform(k3, (hidden_dim, output_dim), jnp.float32, -bound2, bound2)
    b2 = jax.random.uniform(k4, (output_dim,), jnp.float32, -bound2, bound2)
    return w1, b1, w2, b2


def reference_forward(x, w1, b1, w2, b2):
    # Full PyTorch-equivalent reference in f32, INCLUDING the b2 add, to
    # verify the kernel's dropped-b2 shortcut is a semantic no-op.
    h = jnp.maximum(x @ w1 + b1, 0.0)
    logits = h @ w2 + b2
    return jax.nn.softmax(logits, axis=0)


if __name__ == "__main__":
    input_dim, hidden_dim, output_dim = 16, 32, 4
    batch = 8

    key = jax.random.PRNGKey(0)
    kx, kp = jax.random.split(key)
    x = jax.random.normal(kx, (batch, input_dim), jnp.float32)
    w1, b1, w2, b2 = init_params(kp, input_dim, hidden_dim, output_dim)

    out = net_forward(x, w1, b1, w2, b2)
    out = jax.block_until_ready(out)

    ref = reference_forward(x, w1, b1, w2, b2)
    assert out.shape == (batch, output_dim)
    # bf16 MXU operands -> tolerance relaxed vs the pure-f32 reference.
    assert jnp.allclose(out, ref, atol=2e-2, rtol=2e-2), float(jnp.max(jnp.abs(out - ref)))
    # softmax over dim=0 with exact division: columns sum to 1.
    assert jnp.allclose(jnp.sum(out, axis=0), jnp.ones((output_dim,)), atol=1e-4)

    print("KERNEL_OK")
</pallas_src>

<mosaic_0001>
module attributes {stable_mosaic.version = 11 : i64} {
  func.func @net_kernel(%arg0: i32, %arg1: memref<8x16xbf16, #tpu.memory_space<vmem>>, %arg2: memref<16x32xbf16, #tpu.memory_space<vmem>>, %arg3: memref<1x32xf32, #tpu.memory_space<vmem>>, %arg4: memref<32x4xbf16, #tpu.memory_space<vmem>>, %arg5: memref<8x4xf32, #tpu.memory_space<vmem>>, %arg6: memref<8x32xbf16, #tpu.memory_space<vmem>>) attributes {dimension_semantics = [#tpu.dimension_semantics<arbitrary>], iteration_bounds = array<i64: 1>, scalar_prefetch = 0 : i64, scratch_operands = 1 : i64, tpu.core_type = #tpu.core_type<tc>, window_params = [{pipeline_mode = #tpu.pipeline_mode<synchronous>, transform_indices = @transform_0, window_bounds = array<i64: 8, 16>}, {pipeline_mode = #tpu.pipeline_mode<synchronous>, transform_indices = @transform_1, window_bounds = array<i64: 16, 32>}, {pipeline_mode = #tpu.pipeline_mode<synchronous>, transform_indices = @transform_2, window_bounds = array<i64: 1, 32>}, {transform_indices = @transform_3, window_bounds = array<i64: 32, 4>}, {transform_indices = @transform_4, window_bounds = array<i64: 8, 4>}]} {
    %c0_i32 = arith.constant 0 : i32
    %0 = arith.cmpi eq, %arg0, %c0_i32 : i32
    %1 = arith.extui %0 : i1 to i32
    %c0_i32_0 = arith.constant 0 : i32
    %2 = arith.cmpi ne, %1, %c0_i32_0 : i32
    scf.if %2 {
      %c0_8 = arith.constant 0 : index
      %c0_9 = arith.constant 0 : index
      %16 = vector.load %arg1[%c0_8, %c0_9] : memref<8x16xbf16, #tpu.memory_space<vmem>>, vector<8x16xbf16>
      %c0_10 = arith.constant 0 : index
      %c0_11 = arith.constant 0 : index
      %17 = vector.load %arg2[%c0_10, %c0_11] : memref<16x32xbf16, #tpu.memory_space<vmem>>, vector<16x32xbf16>
      %cst_12 = arith.constant dense<0.000000e+00> : vector<8x32xf32>
      %18 = tpu.matmul %16, %17, %cst_12 {dimension_numbers = #tpu.dot_dimension_numbers<[1], [0], [0], [1], [0, 0, 1, 1], [], []>} : vector<8x16xbf16>, vector<16x32xbf16>, vector<8x32xf32> -> vector<8x32xf32>
      %c0_13 = arith.constant 0 : index
      %c0_14 = arith.constant 0 : index
      %19 = vector.load %arg3[%c0_13, %c0_14] : memref<1x32xf32, #tpu.memory_space<vmem>>, vector<1x32xf32>
      %20 = vector.broadcast %19 : vector<1x32xf32> to vector<8x32xf32>
      %21 = arith.addf %18, %20 : vector<8x32xf32>
      %cst_15 = arith.constant 0.000000e+00 : f32
      %22 = vector.broadcast %cst_15 : f32 to vector<8x32xf32>
      %23 = arith.maximumf %21, %22 : vector<8x32xf32>
      %24 = arith.truncf %23 : vector<8x32xf32> to vector<8x32xbf16>
      %c0_16 = arith.constant 0 : index
      %c0_17 = arith.constant 0 : index
      %25 = vector.load %arg6[%c0_16, %c0_17] : memref<8x32xbf16, #tpu.memory_space<vmem>>, vector<8x32xbf16>
      tpu.vector_store %arg6[%c0_16, %c0_17], %24 {strides = array<i32>} : memref<8x32xbf16, #tpu.memory_space<vmem>>, vector<8x32xbf16>,
    } else {
    }
    %c0 = arith.constant 0 : index
    %c0_1 = arith.constant 0 : index
    %3 = vector.load %arg6[%c0, %c0_1] : memref<8x32xbf16, #tpu.memory_space<vmem>>, vector<8x32xbf16>
    %c0_2 = arith.constant 0 : index
    %c0_3 = arith.constant 0 : index
    %4 = vector.load %arg4[%c0_2, %c0_3] : memref<32x4xbf16, #tpu.memory_space<vmem>>, vector<32x4xbf16>
    %cst = arith.constant dense<0.000000e+00> : vector<8x4xf32>
    %5 = tpu.matmul %3, %4, %cst {dimension_numbers = #tpu.dot_dimension_numbers<[1], [0], [0], [1], [0, 0, 1, 1], [], []>} : vector<8x32xbf16>, vector<32x4xbf16>, vector<8x4xf32> -> vector<8x4xf32>
    %cst_4 = arith.constant dense<0xFF800000> : vector<4xf32>
    %6 = vector.multi_reduction <maximumf>, %5, %cst_4 [0] : vector<8x4xf32> to vector<4xf32>
    %7 = vector.shape_cast %6 : vector<4xf32> to vector<1x4xf32>
    %8 = vector.broadcast %7 : vector<1x4xf32> to vector<8x4xf32>
    %9 = arith.subf %5, %8 : vector<8x4xf32>
    %10 = math.exp %9 : vector<8x4xf32>
    %cst_5 = arith.constant dense<0.000000e+00> : vector<4xf32>
    %11 = vector.multi_reduction <add>, %10, %cst_5 [0] : vector<8x4xf32> to vector<4xf32>
    %12 = vector.shape_cast %11 : vector<4xf32> to vector<1x4xf32>
    %13 = vector.broadcast %12 : vector<1x4xf32> to vector<8x4xf32>
    %14 = arith.divf %10, %13 : vector<8x4xf32>
    %c0_6 = arith.constant 0 : index
    %c0_7 = arith.constant 0 : index
    %15 = vector.load %arg5[%c0_6, %c0_7] : memref<8x4xf32, #tpu.memory_space<vmem>>, vector<8x4xf32>
    tpu.vector_store %arg5[%c0_6, %c0_7], %14 {strides = array<i32>} : memref<8x4xf32, #tpu.memory_space<vmem>>, vector<8x4xf32>,
    return
  }
  func.func @transform_0(%arg0: i32) -> (i32, i32) {
    %c0_i32 = arith.constant 0 : i32
    %c0_i32_0 = arith.constant 0 : i32
    %c0_i32_1 = arith.constant 0 : i32
    return %c0_i32, %c0_i32_0 : i32, i32
  }
  func.func @transform_1(%arg0: i32) -> (i32, i32) {
    %c0_i32 = arith.constant 0 : i32
    %c0_i32_0 = arith.constant 0 : i32
    %c0_i32_1 = arith.constant 0 : i32
    return %c0_i32, %c0_i32_0 : i32, i32
  }
  func.func @transform_2(%arg0: i32) -> (i32, i32) {
    %c0_i32 = arith.constant 0 : i32
    %c0_i32_0 = arith.constant 0 : i32
    %c0_i32_1 = arith.constant 0 : i32
    return %c0_i32, %c0_i32_0 : i32, i32
  }
  func.func @transform_3(%arg0: i32) -> (i32, i32) {
    %c0_i32 = arith.constant 0 : i32
    %c0_i32_0 = arith.constant 0 : i32
    return %c0_i32, %arg0 : i32, i32
  }
  func.func @transform_4(%arg0: i32) -> (i32, i32) {
    %c0_i32 = arith.constant 0 : i32
    %c0_i32_0 = arith.constant 0 : i32
    return %c0_i32, %arg0 : i32, i32
  }
}

</mosaic_0001>

<bundles_post_ra>
// kernel: tpu_custom_call.1
= control target key start
LH: loop header
LB: loop body
LE: loop exit
PB: predicated region body
PF: predicated region fallthrough
CT: control target
= control target key end

     0   :  { %vm35_vm0 = vcmask 130048   ;;  %vm54_vm1 = vcmask 257024   ;;  %vm73_vm2 = vcmask 261120   ;;  %vm90_vm3 = vcmask 31744   ;;  %s196_s1 = inlined_call_operand.vmem [shape: bf16[16,32], index: 1, kind: input, shape index: {}]   ;;  %s197_s0 = inlined_call_operand.vmem [shape: bf16[8,16], index: 0, kind: input, shape index: {}]   ;;  %s198_s2 = inlined_call_operand.vmem [shape: f32[1,32], index: 2, kind: input, shape index: {}]   ;;  %s199_s3 = inlined_call_operand.vmem [shape: bf16[32,4], index: 3, kind: input, shape index: {}]   ;;  %s200_s4 = inlined_call_operand.vmem [shape: f32[8,4], index: 4, kind: output, shape index: {}]  }
   0x1   :  { %v142_v0 = vld [vmem:[%s196_s1] sm:$0xff]  ;;  %v144_v2 = vld [vmem:[%s199_s3 + $0x8] sm:$0xff] }
   0x2   :  { %46 = vmatpush.bf16.msra.mxu0 %v142_v0  ;;  %v22_v1 = vld [vmem:[%s197_s0] sm:$0xf]  ;;  %83 = vmatpush.bf16.msra.mxu1 %v144_v2 }
   0x3   :  { %v143_v3 = vld [vmem:[%s199_s3] sm:$0xff] }
   0x4   :  { %v145_v4 = vld [vmem:[%s198_s2] ss:$0 sm:$0xff] }
   0x5   :  { %132 = vmatmul.msk.bf16.vlgmr.msra.gmra.mxu0 %vm35_vm0, %v22_v1 }
   0x6   :  { %84 = vmatpush.bf16.msra.mxu1 %v143_v3 }
  0x82   :  { %v48_v5 = vpop.f32.mrf.mxu0 }
  0x83   :  { %v49_v6 = vadd.f32 %v145_v4, %v48_v5 }
  0x85   :  { %v52_v7 = vmax.f32 %v49_v6, 0.0 }
  0x87   :  { %v53_v8 = vpack.c.bf16 %v52_v7, %v52_v7 }
  0x89   :  { %55 = vst.msk [vmem:[#allocation2] sm:$0xf] %vm54_vm1, %v53_v8 }
  0x8a   :  { %v50_v9 = vpop.f32.mrf.mxu0 }
  0x90   :  { %v56_v10 = vld [vmem:[#allocation2] sm:$0xf] }
  0x91   :  { %141 = vmatmul.msk.bf16.vlgmr.msra.gmra.mxu1 %vm73_vm2, %v56_v10 }
 0x10e   :  { %v86_v11 = vpop.f32.mrf.mxu1 }
 0x10f   :  { %v91_v12 = vsel %vm90_vm3, %v86_v11, -inf }
 0x110   :  { %v92_v13 = vrot.slane %v91_v12, 4 }
 0x112   :  { %v93_v14 = vmax.f32 %v91_v12, %v92_v13 }
 0x114   :  { %v94_v15 = vrot.slane %v93_v14, 2 }
 0x116   :  { %v95_v16 = vmax.f32 %v93_v14, %v94_v15  ;;  %v88_v17 = vpop.f32.mrf.mxu1 }
 0x118   :  { %v96_v18 = vrot.slane %v95_v16, 1 }
 0x11a   :  { %v97_v19 = vmax.f32 %v95_v16, %v96_v18 }
 0x11c   :  { %v98_v20 = vsub.f32 %v86_v11, %v97_v19 }
 0x11e   :  { %v99_v21 = vmul.f32 1.442695, %v98_v20 }
 0x120   :  { %146 = vpow2.f32 %v99_v21 }
 0x126   :  { %v147_v22 = vpop.eup %146 }
 0x127   :  { %v101_v23 = vsel %vm90_vm3, %v147_v22, 0.0 }
 0x128   :  { %v102_v24 = vrot.slane %v101_v23, 4 }
 0x12a   :  { %v103_v25 = vadd.f32 %v102_v24, %v101_v23 }
 0x12c   :  { %v104_v26 = vrot.slane %v103_v25, 2 }
 0x12e   :  { %v105_v27 = vadd.f32 %v104_v26, %v103_v25 }
 0x130   :  { %v106_v28 = vrot.slane %v105_v27, 1 }
 0x132   :  { %v107_v29 = vadd.f32 %v106_v28, %v105_v27 }
 0x134   :  { %148 = vrcp.f32 %v107_v29  ;;  %v119_v33 = vand.u32 2147483648, %v107_v29  ;;  %v117_v35 = vand.u32 2147483647, %v107_v29  ;;  %vm113_vm5 = vweird.f32 %v107_v29 }
 0x136   :  { %v120_v37 = vor.u32 1.1754944e-38, %v119_v33  ;;  %vm118_vm7 = vcmp.eq.f32.partialorder %v117_v35, 8.507059e+37 }
 0x13a   :  { %v149_v30 = vpop.eup %148 }
 0x13b   :  { %v109_v31 = vmul.f32 %v149_v30, %v107_v29  ;;  %vm114_vm4 = vweird.f32 %v149_v30 }
 0x13c   :  { %vm115_vm6 = vmor %vm113_vm5, %vm114_vm4 }
 0x13d   :  { %v110_v32 = vsub.f32 1.0, %v109_v31 }
 0x13f   :  { %v111_v34 = vmul.f32 %v149_v30, %v110_v32 }
 0x141   :  { %v112_v36 = vadd.f32 %v149_v30, %v111_v34 }
 0x143   :  { %v116_v38 = vsel %vm115_vm6, %v149_v30, %v112_v36 }
 0x144   :  { %v121_v39 = vsel %vm118_vm7, %v120_v37, %v116_v38 }
 0x145   :  { %v122_v40 = vmul.f32 %v147_v22, %v121_v39 }
 0x147   :  { %123 = vst.msk [vmem:[%s200_s4] sm:$0xff] %vm90_vm3, %v122_v40 }

</bundles_post_ra>
